<compile_context>
chip_gen: v5e
topology: v5e:2x2
jax: 0.10.0
libtpu: 0.0.40
codegen_flags: <defaults>
</compile_context>

<pallas_src>
import functools

import jax
import jax.numpy as jnp
from jax.experimental import pallas as pl
from jax.experimental.pallas import tpu as pltpu

# Pooling hyper-parameters (tcases[0]: kernel=3, stride=2, padding=0)
KERNEL_SIZE = 3
STRIDE = 2
PADDING = 0


def _round_up(x, m):
    return (x + m - 1) // m * m


def _maxpool_kernel(x_ref, o_ref, t_ref, *, kernel_size, stride):
    # x_ref: (Cb, H,  W )  folded (N*C) channels leading; H on sublanes, W on lanes
    # o_ref: (Cb, Ho, Wo)
    # t_ref: (Cb, Wv, Ho)  VMEM scratch for the lane->sublane bounce
    cb, ho, wo = o_ref.shape
    w = x_ref.shape[-1]
    wv = w - kernel_size + 1  # number of valid horizontal window positions

    # ---- H direction: k-tap max fused with the stride-S row decimation. ----
    # Sublane-strided ref reads (stride on the second-to-last dim) lower to
    # the cheap strided vector-load path.  (Note: for sub-32-bit dtypes the
    # packed-sublane layout would make this less cheap; f32 is unaffected.)
    hmax = x_ref[:, pl.ds(0, ho, stride), :]
    for kh in range(1, kernel_size):
        hmax = jnp.maximum(hmax, x_ref[:, pl.ds(kh, ho, stride), :])
    # hmax: (Cb, Ho, W)

    # ---- W direction: k-tap max with contiguous (unit-stride) lane slices. --
    wmax = hmax[..., 0:wv]
    for kw in range(1, kernel_size):
        wmax = jnp.maximum(wmax, hmax[..., kw:kw + wv])
    # wmax: (Cb, Ho, Wv)

    if stride == 1:
        # No column decimation needed (Wv == Wo).
        o_ref[...] = wmax.astype(o_ref.dtype)
        return

    # ---- W stride-S decimation ----
    # Lane-strided selection is layout-hostile on TPU, so: transpose the two
    # minor dims (XLU), bounce through VMEM scratch, take a sublane-strided
    # read, transpose back.
    # TODO(synk): replace with a 0/1 selection-matrix matmul on the otherwise
    # idle MXU (exact for padding=0); wall-neutral in the current regime.
    t_ref[...] = jnp.swapaxes(wmax, -1, -2)        # (Cb, Wv, Ho)
    sel = t_ref[:, pl.ds(0, wo, stride), :]        # (Cb, Wo, Ho)
    o_ref[...] = jnp.swapaxes(sel, -1, -2).astype(o_ref.dtype)


def _pick_channel_block(nc, h, w, itemsize):
    """Channels per grid step.

    Big enough to escape per-step (~0.35 us) overhead, small enough to keep
    >=2 'parallel' grid steps (v7x has 2 TensorCores) and to stay far inside
    v7x's 64 MiB physical / 32 MiB scoped VMEM with double-buffering.
    """
    # (8,128)-padded per-channel input plane in VMEM.
    plane = _round_up(h, 8) * _round_up(w, 128) * itemsize
    target = 2 << 20  # ~2 MiB per input block (double-buffered by Pallas)
    cb = max(1, min(nc, target // plane))
    if nc >= 2:
        cb = min(cb, nc // 2)   # keep >= 2 grid steps for v7x megacore
    cb = max(1, cb)
    # Prefer a divisor of nc: a partial last block is still correct (Pallas
    # clips the writeback) but wastes compute on garbage channels.
    for d in range(cb, 0, -1):
        if nc % d == 0:
            if 2 * d >= cb:
                return d
            break
    return cb


def maxpool2d_nchw(x, *, kernel_size=KERNEL_SIZE, stride=STRIDE,
                   padding=PADDING):
    """MaxPool2d(kernel_size, stride, padding) on NCHW input, NCHW output."""
    n, c, h, w = x.shape

    if padding > 0:
        # TODO(synk): fold padding into the kernel (masked edge taps) to avoid
        # this extra HBM pass; dead code for tcases[0] (padding=0).
        if jnp.issubdtype(x.dtype, jnp.floating):
            pad_val = -jnp.inf
        else:
            pad_val = jnp.iinfo(x.dtype).min
        x = jnp.pad(
            x,
            ((0, 0), (0, 0), (padding, padding), (padding, padding)),
            constant_values=pad_val,
        )
        h += 2 * padding
        w += 2 * padding

    ho = (h - kernel_size) // stride + 1
    wo = (w - kernel_size) // stride + 1
    wv = w - kernel_size + 1

    nc = n * c
    xf = x.reshape(nc, h, w)  # free, contiguous: fold N and C into one axis
    cb = _pick_channel_block(nc, h, w, x.dtype.itemsize)
    grid = (pl.cdiv(nc, cb),)

    kernel = functools.partial(
        _maxpool_kernel, kernel_size=kernel_size, stride=stride)

    out = pl.pallas_call(
        kernel,
        out_shape=jax.ShapeDtypeStruct((nc, ho, wo), x.dtype),
        grid=grid,
        in_specs=[pl.BlockSpec((cb, h, w), lambda i: (i, 0, 0))],
        out_specs=pl.BlockSpec((cb, ho, wo), lambda i: (i, 0, 0)),
        scratch_shapes=[pltpu.VMEM((cb, wv, ho), x.dtype)],
        compiler_params=pltpu.CompilerParams(
            dimension_semantics=("parallel",)),
    )(xf)
    return out.reshape(n, c, ho, wo)


def _reference(x, kernel_size, stride):
    return jax.lax.reduce_window(
        x,
        -jnp.inf,
        jax.lax.max,
        window_dimensions=(1, 1, kernel_size, kernel_size),
        window_strides=(1, 1, stride, stride),
        padding="VALID",
    )


if __name__ == "__main__":
    key = jax.random.PRNGKey(0)

    # Small deterministic NCHW input consistent with the module's forward.
    N, C, H, W = 2, 8, 16, 16
    x = jax.random.normal(key, (N, C, H, W), dtype=jnp.float32)

    y = jax.block_until_ready(maxpool2d_nchw(x))
    ref = _reference(x, KERNEL_SIZE, STRIDE)
    assert y.shape == ref.shape, (y.shape, ref.shape)
    assert jnp.allclose(y, ref), "Pallas maxpool mismatch vs reference (small)"

    # Also validate at the spec's real tcases[0] shape (1, 96, 55, 55) -> 27x27
    # (exercises cb=48, grid=(2,) — two parallel steps for v7x megacore).
    x_big = jax.random.normal(jax.random.PRNGKey(1), (1, 96, 55, 55),
                              dtype=jnp.float32)
    y_big = jax.block_until_ready(maxpool2d_nchw(x_big))
    ref_big = _reference(x_big, KERNEL_SIZE, STRIDE)
    assert y_big.shape == ref_big.shape, (y_big.shape, ref_big.shape)
    assert jnp.allclose(y_big, ref_big), \
        "Pallas maxpool mismatch vs reference (tcase0)"

    print("KERNEL_OK")
</pallas_src>

<mosaic_0001>
module attributes {stable_mosaic.version = 11 : i64} {
  func.func @_maxpool_kernel(%arg0: i32, %arg1: memref<8x16x16xf32, #tpu.memory_space<vmem>>, %arg2: memref<8x7x7xf32, #tpu.memory_space<vmem>>, %arg3: memref<8x14x7xf32, #tpu.memory_space<vmem>>) attributes {dimension_semantics = [#tpu.dimension_semantics<parallel>], iteration_bounds = array<i64: 2>, scalar_prefetch = 0 : i64, scratch_operands = 1 : i64, tpu.core_type = #tpu.core_type<tc>, window_params = [{transform_indices = @transform_0, window_bounds = array<i64: 8, 16, 16>}, {transform_indices = @transform_1, window_bounds = array<i64: 8, 7, 7>}]} {
    %c0 = arith.constant 0 : index
    %c0_0 = arith.constant 0 : index
    %c0_1 = arith.constant 0 : index
    %0 = tpu.strided_load %arg1[%c0, %c0_0, %c0_1] {strides = array<i32: 1, 2, 1>} : memref<8x16x16xf32, #tpu.memory_space<vmem>>, vector<8x7x16xf32>
    %c0_2 = arith.constant 0 : index
    %c1 = arith.constant 1 : index
    %c0_3 = arith.constant 0 : index
    %1 = tpu.strided_load %arg1[%c0_2, %c1, %c0_3] {strides = array<i32: 1, 2, 1>} : memref<8x16x16xf32, #tpu.memory_space<vmem>>, vector<8x7x16xf32>
    %2 = arith.maximumf %0, %1 : vector<8x7x16xf32>
    %c0_4 = arith.constant 0 : index
    %c2 = arith.constant 2 : index
    %c0_5 = arith.constant 0 : index
    %3 = tpu.strided_load %arg1[%c0_4, %c2, %c0_5] {strides = array<i32: 1, 2, 1>} : memref<8x16x16xf32, #tpu.memory_space<vmem>>, vector<8x7x16xf32>
    %4 = arith.maximumf %2, %3 : vector<8x7x16xf32>
    %5 = vector.extract_strided_slice %4 {offsets = [0, 0, 0], sizes = [8, 7, 14], strides = [1, 1, 1]} : vector<8x7x16xf32> to vector<8x7x14xf32>
    %6 = vector.extract_strided_slice %4 {offsets = [0, 0, 1], sizes = [8, 7, 14], strides = [1, 1, 1]} : vector<8x7x16xf32> to vector<8x7x14xf32>
    %7 = arith.maximumf %5, %6 : vector<8x7x14xf32>
    %8 = vector.extract_strided_slice %4 {offsets = [0, 0, 2], sizes = [8, 7, 14], strides = [1, 1, 1]} : vector<8x7x16xf32> to vector<8x7x14xf32>
    %9 = arith.maximumf %7, %8 : vector<8x7x14xf32>
    %10 = tpu.transpose %9, [0, 2, 1] : vector<8x7x14xf32> -> vector<8x14x7xf32>
    %c0_6 = arith.constant 0 : index
    %c0_7 = arith.constant 0 : index
    %c0_8 = arith.constant 0 : index
    %11 = vector.load %arg3[%c0_6, %c0_7, %c0_8] : memref<8x14x7xf32, #tpu.memory_space<vmem>>, vector<8x14x7xf32>
    tpu.vector_store %arg3[%c0_6, %c0_7, %c0_8], %10 {strides = array<i32>} : memref<8x14x7xf32, #tpu.memory_space<vmem>>, vector<8x14x7xf32>,
    %c0_9 = arith.constant 0 : index
    %c0_10 = arith.constant 0 : index
    %c0_11 = arith.constant 0 : index
    %12 = tpu.strided_load %arg3[%c0_9, %c0_10, %c0_11] {strides = array<i32: 1, 2, 1>} : memref<8x14x7xf32, #tpu.memory_space<vmem>>, vector<8x7x7xf32>
    %13 = tpu.transpose %12, [0, 2, 1] : vector<8x7x7xf32> -> vector<8x7x7xf32>
    %c0_12 = arith.constant 0 : index
    %c0_13 = arith.constant 0 : index
    %c0_14 = arith.constant 0 : index
    %14 = vector.load %arg2[%c0_12, %c0_13, %c0_14] : memref<8x7x7xf32, #tpu.memory_space<vmem>>, vector<8x7x7xf32>
    tpu.vector_store %arg2[%c0_12, %c0_13, %c0_14], %13 {strides = array<i32>} : memref<8x7x7xf32, #tpu.memory_space<vmem>>, vector<8x7x7xf32>,
    return
  }
  func.func @transform_0(%arg0: i32) -> (i32, i32, i32) {
    %c0_i32 = arith.constant 0 : i32
    %c0_i32_0 = arith.constant 0 : i32
    %c0_i32_1 = arith.constant 0 : i32
    return %arg0, %c0_i32, %c0_i32_0 : i32, i32, i32
  }
  func.func @transform_1(%arg0: i32) -> (i32, i32, i32) {
    %c0_i32 = arith.constant 0 : i32
    %c0_i32_0 = arith.constant 0 : i32
    %c0_i32_1 = arith.constant 0 : i32
    return %arg0, %c0_i32, %c0_i32_0 : i32, i32, i32
  }
}

</mosaic_0001>

<bundles_post_ra>
// kernel: tpu_custom_call.1
= control target key start
LH: loop header
LB: loop body
LE: loop exit
PB: predicated region body
PF: predicated region fallthrough
CT: control target
= control target key end

     0   :  { %6 = vsyncpa [#allocation4], 0  ;;  %s1220_s0 = inlined_call_operand.hbm [shape: f32[16,16,16], index: 0, kind: input, shape index: {}]   ;;  %s1221_s1 = inlined_call_operand.vmem [shape: f32[16,7,7], index: 1, kind: output, shape index: {}]  }
   0x1   :  { %8 = vsyncpa [#allocation4 + $0x1], 0  ;;  %s1061_s6 = smov 0   ;;  %s1063_s7 = smov 0  }
   0x2   :  { %s1065_s8 = smov 0   ;;  %s1067_s9 = smov 0  }
   0x3 LB: > { %s898_s10 = sadd.s32 4294967295, %s1045_s9   ;;  %s1081_s11 = sadd.s32 1, %s1045_s9   ;;  %s1045_s9 = sphi %s1067_s9, %s1228_s9   ;;  %s1041_s8 = sphi %s1065_s8, %s1227_s8   ;;  %s1037_s7 = sphi %s1063_s7, %s1226_s7   ;;  %s1033_s6 = sphi %s1061_s6, %s1225_s6  }
   0x4   : > { %s18_s12 = ssub.s32 %s1045_s9, %s1081_s11  ;;  %s21_s13 = sadd.s32 1, %s1041_s8 }
   0x5   : > { %p19_p0 = scmp.eq.s32.totalorder %s18_s12, 0  ;;  %p28_p1 = scmp.ne.s32.totalorder %s1041_s8, %s1037_s7 }
   0x6   : > { %p29_p2 = scmp.eq.s32.totalorder %s1045_s9, 0  ;;  %p34_p3 = scmp.ne.s32.totalorder %s1037_s7, %s1033_s6 }
   0x7   : > { %s1091_s14 = scalar_select %p19_p0, %s1041_s8, %s21_s13  }
   0x8   : > { %p1093_p4 = por %p29_p2, %p28_p1  ;;  %p35_p5 = scmp.eq.s32.totalorder %s898_s10, 0 }
   0x9   : > { %p943_p6 = scmp.lt.s32.totalorder %s1045_s9, 2  ;;  %s84_s17 = sand.u32 1, %s1041_s8  }
   0xa   : > { %p1100_p7 = por %p35_p5, %p34_p3  ;;  %s902_s18 = sshll.u32 %s84_s17, 7 }
   0xb   : > { %s936_s19 = sshll.u32 %s1045_s9, 7  ;;  %s88_s23 = scalar_lea.vmem [#allocation3], %s902_s18 }
   0xc   : > { %s94_s22 = scalar_lea.hbm %s1220_s0, %s936_s19  ;;  %s97_s24 = sshll.u32 %s88_s23, 4  ;;  %s98_s24 = int_to_ptr.vmem [resolvable:$true] %s97_s24 }
   0xd   : > { %s95_s25 = sshll.u32 %s94_s22, 4  ;;  %p1111_p8 = pnand %p943_p6, %p1093_p4  ;;  %s96_s25 = int_to_ptr.hbm [resolvable:$true] %s95_s25 }
   0xe   : > { %p906_p9 = scmp.ge.s32.totalorder %s1045_s9, 1  ;;  %s85_s27 = scalar_lea.sflag [#allocation4], %s84_s17 }
   0xf   : > { %s981_s28 = sshra.s32 %s96_s25, 4  ;;  %p985_p11 = pneg %p1111_p8  ;;  %s982_s28 = int_to_ptr.hbm [resolvable:$true] %s981_s28 }
  0x10   : > { %s983_s29 = scalar_lea.hbm %s982_s28, 128  ;;  %s988_s3 = scalar_lea.hbm %s1220_s0, 256 }
  0x11   : > { %p984_p10 = scmp.ne.s32.totalorder %s982_s28, %s983_s29  ;;  %p989_p0 = scmp.lt.s32.totalorder %s982_s28, %s1220_s0 }
  0x12   : > { %p990_p1 = scmp.lt.s32.totalorder %s988_s3, %s983_s29 }
  0x13   : > { %p986_p12 = pnand %p985_p11, %p984_p10 }
  0x14   : > { %p991_p2 = por %p990_p1, %p989_p0 }
  0x15   : > { %p987_p13 = pneg %p986_p12 }
  0x17   : > { %p992_p3 = pnand %p991_p2, %p987_p13 }
  0x19   : > { %995 = shalt.err (!%p992_p3)
}
  0x1a   : > { %s1047_s6 = smov 128   ;;  %s1048_s12 = smov 8  }
  0x1b   : > { %942 = dma.hbm_to_vmem [thread:$0]  (!%p1111_p8), %s96_s25, 2048, %s98_s24, %s85_s27, %s1047_s6, %s1047_s6, %s1048_s12  }
  0x1c   : > { %p105_p4 = scmp.lt.s32.totalorder %s1045_s9, 3 }
  0x1e   : > { %p106_p5 = pnand %p906_p9, %p105_p4 }
  0x1f   : > { %s111_s13 = sand.u32 (!%p106_p5), 1, %s1037_s7  }
  0x20   : > { %109 = sbr.rel (%p106_p5) target bundleno = 554 (0x22a), region = 24  ;;  %s907_s15 = sshll.u32 (!%p106_p5), %s111_s13, 7 }
  0x21   : > { %s112_s17 = scalar_lea.sflag (!%p106_p5), [#allocation4], %s111_s13  ;;  %s1130_s18 = scalar_lea.vmem (!%p106_p5), [#allocation3], %s907_s15 }
  0x25   : > { %1028 = dma.done.wait (%p1100_p7), %s112_s17, 2048  }
  0x26   : > { %1030 = vsyncadd (%p1100_p7), %s112_s17, 4294965248  ;;  %v911_v0 = vld [vmem:[%s1130_s18 + $0x20] ss:$2 sm:$0x7f]  ;;  %s1049_s16 = smov 127   ;;  %s1050_s19 = smov 126  }
  0x27   : > { %v919_v1 = vld [vmem:[%s1130_s18 + $0x21] ss:$2 sm:$0x7f]  ;;  %v927_v3 = vld [vmem:[%s1130_s18 + $0x22] ss:$2 sm:$0x7f] }
  0x28   : > { %v175_v2 = vmax.f32 %v911_v0, %v919_v1  ;;  %v142_v4 = vld [vmem:[%s1130_s18] ss:$2 sm:$0x7f]  ;;  %v917_v5 = vld [vmem:[%s1130_s18 + $0x1] ss:$2 sm:$0x7f] }
  0x29   : > { %v925_v6 = vld [vmem:[%s1130_s18 + $0x2] ss:$2 sm:$0x7f]  ;;  %v173_v8 = vmax.f32 %v142_v4, %v917_v5  ;;  %v912_v9 = vld [vmem:[%s1130_s18 + $0x30] ss:$2 sm:$0x7f] }
  0x2a   : > { %v1142_v7 = vmax.f32 %v175_v2, %v927_v3  ;;  %v920_v10 = vld [vmem:[%s1130_s18 + $0x31] ss:$2 sm:$0x7f]  ;;  %v910_v11 = vld [vmem:[%s1130_s18 + $0x10] ss:$2 sm:$0x7f] }
  0x2b   : > { %v197_v12 = vmax.f32 %v173_v8, %v925_v6  ;;  %v176_v13 = vmax.f32 %v912_v9, %v920_v10  ;;  %v928_v14 = vld [vmem:[%s1130_s18 + $0x32] ss:$2 sm:$0x7f]  ;;  %v918_v15 = vld [vmem:[%s1130_s18 + $0x11] ss:$2 sm:$0x7f] }
  0x2c   : > { %217 = vrot.lane.b32.xlu1 %v1142_v7, %s1049_s16  ;;  %v913_v16 = vld [vmem:[%s1130_s18 + $0x40] ss:$2 sm:$0x7f]  ;;  %v921_v17 = vld [vmem:[%s1130_s18 + $0x41] ss:$2 sm:$0x7f]  ;;  %v174_v18 = vmax.f32 %v910_v11, %v918_v15 }
  0x2d   : > { %213 = vrot.lane.b32.xlu0 %v197_v12, %s1049_s16  ;;  %v177_v19 = vmax.f32 %v913_v16, %v921_v17  ;;  %v929_v20 = vld [vmem:[%s1130_s18 + $0x42] ss:$2 sm:$0x7f]  ;;  %v926_v21 = vld [vmem:[%s1130_s18 + $0x12] ss:$2 sm:$0x7f]  ;;  %v1156_v22 = vmax.f32 %v176_v13, %v928_v14 }
  0x2e   : > { %v916_v24 = vld [vmem:[%s1130_s18 + $0x70] ss:$2 sm:$0x7f]  ;;  %v924_v25 = vld [vmem:[%s1130_s18 + $0x71] ss:$2 sm:$0x7f]  ;;  %v198_v27 = vmax.f32 %v174_v18, %v926_v21 }
  0x2f   : > { %v201_v23 = vmax.f32 %v177_v19, %v929_v20  ;;  %v914_v26 = vld [vmem:[%s1130_s18 + $0x50] ss:$2 sm:$0x7f]  ;;  %v915_v28 = vld [vmem:[%s1130_s18 + $0x60] ss:$2 sm:$0x7f]  ;;  %v180_v33 = vmax.f32 %v916_v24, %v924_v25 }
  0x30   : > { %v922_v29 = vld [vmem:[%s1130_s18 + $0x51] ss:$2 sm:$0x7f]  ;;  %v923_v30 = vld [vmem:[%s1130_s18 + $0x61] ss:$2 sm:$0x7f] }
  0x31   : > { %221 = vrot.lane.b32.xlu2 %v201_v23, %s1049_s16  ;;  %v178_v31 = vmax.f32 %v914_v26, %v922_v29  ;;  %v930_v32 = vld [vmem:[%s1130_s18 + $0x52] ss:$2 sm:$0x7f]  ;;  %v179_v35 = vmax.f32 %v915_v28, %v923_v30  ;;  %v931_v37 = vld [vmem:[%s1130_s18 + $0x62] ss:$2 sm:$0x7f] }
  0x32   : > { %v932_v34 = vld [vmem:[%s1130_s18 + $0x72] ss:$2 sm:$0x7f]  ;;  %vm533_vm0 = vcmask 56320   ;;  %vm535_vm1 = vcmask 54272   ;;  %s908_s20 = sshll.u32 %s898_s10, 3 }
  0x33   : > { %v202_v36 = vmax.f32 %v178_v31, %v930_v32  ;;  %v204_v38 = vmax.f32 %v180_v33, %v932_v34  ;;  %v203_v39 = vmax.f32 %v179_v35, %v931_v37  ;;  %p137_p6 = scmp.lt.s32.totalorder %s908_s20, 15  ;;  %vm822_vm2 = vcmask 55296  }
  0x34   : > { %219 = vrot.lane.b32.xlu1 %v1156_v22, %s1049_s16 }
  0x35   : > { %215 = vrot.lane.b32.xlu0 %v198_v27, %s1049_s16  ;;  %s1230_s20 = smov (!%p137_p6, %s908_s20), 15 }
  0x36   : > { %s909_s21 = sshll.u32 %s1230_s20, 3 }
  0x37   : > { %s140_s24 = scalar_lea.vmem %s1221_s1, %s909_s21 }
  0x39   : > { %223 = vrot.lane.b32.xlu2 %v202_v36, %s1049_s16 }
  0x3c   : > { %227 = vrot.lane.b32.xlu1 %v204_v38, %s1049_s16 }
  0x3d   : > { %225 = vrot.lane.b32.xlu0 %v203_v39, %s1049_s16 }
  0x41   : > { %245 = vrot.lane.b32.xlu2 %v197_v12, %s1050_s19 }
  0x44   : > { %249 = vrot.lane.b32.xlu1 %v1142_v7, %s1050_s19 }
  0x45   : > { %247 = vrot.lane.b32.xlu0 %v198_v27, %s1050_s19 }
  0x49   : > { %251 = vrot.lane.b32.xlu2 %v1156_v22, %s1050_s19 }
  0x4c   : > { %255 = vrot.lane.b32.xlu1 %v202_v36, %s1050_s19 }
  0x4d   : > { %253 = vrot.lane.b32.xlu0 %v201_v23, %s1050_s19 }
  0x51   : > { %257 = vrot.lane.b32.xlu2 %v203_v39, %s1050_s19 }
  0x55   : > { %259 = vrot.lane.b32.xlu0 %v204_v38, %s1050_s19 }
  0x8b   : > { %v222_v40 = vpop.permute.xlu2 %221 }
  0x8c   : > { %v241_v61 = vmax.f32 %v201_v23, %v222_v40 }
  0x93   : > { %v224_v41 = vpop.permute.xlu2 %223 }
  0x94   : > { %v242_v57 = vmax.f32 %v202_v36, %v224_v41 }
  0x9b   : > { %v246_v44 = vpop.permute.xlu2 %245 }
  0x9e   : > { %v218_v42 = vpop.permute.xlu1 %217 }
  0x9f   : > { %v214_v43 = vpop.permute.xlu0 %213  ;;  %v239_v51 = vmax.f32 %v1142_v7, %v218_v42 }
  0xa0   : > { %v237_v45 = vmax.f32 %v197_v12, %v214_v43 }
  0xa2   : > { %v269_v46 = vmax.f32 %v237_v45, %v246_v44 }
  0xa3   : > { %v252_v63 = vpop.permute.xlu2 %251 }
  0xa4   : > { %277 = vxpose.xlu1.b32.start.end [1/1] (short) (narrow) %v269_v46, 16 }
  0xa6   : > { %v220_v47 = vpop.permute.xlu1 %219 }
  0xa7   : > { %v216_v48 = vpop.permute.xlu0 %215  ;;  %v240_v62 = vmax.f32 %v1156_v22, %v220_v47 }
  0xa8   : > { %v238_v53 = vmax.f32 %v198_v27, %v216_v48 }
  0xa9   : > { %v272_v1 = vmax.f32 %v240_v62, %v252_v63 }
  0xab   : > { %v258_v5 = vpop.permute.xlu2 %257 }
  0xae   : > { %v228_v49 = vpop.permute.xlu1 %227 }
  0xaf   : > { %v226_v50 = vpop.permute.xlu0 %225  ;;  %v244_v3 = vmax.f32 %v204_v38, %v228_v49 }
  0xb0   : > { %v243_v4 = vmax.f32 %v203_v39, %v226_v50 }
  0xb2   : > { %v275_v7 = vmax.f32 %v243_v4, %v258_v5 }
  0xb6   : > { %v250_v52 = vpop.permute.xlu1 %249 }
  0xb7   : > { %v271_v54 = vmax.f32 %v239_v51, %v250_v52  ;;  %v248_v55 = vpop.permute.xlu0 %247 }
  0xb8   : > { %v270_v56 = vmax.f32 %v238_v53, %v248_v55 }
  0xb9   : > { %341 = vxpose.xlu0.b32.start.end [1/1] (short) (narrow) %v271_v54, 16 }
  0xba   : > { %309 = vxpose.xlu2.b32.start.end [1/1] (short) (narrow) %v270_v56, 16 }
  0xbe   : > { %v256_v58 = vpop.permute.xlu1 %255 }
  0xbf   : > { %v274_v59 = vmax.f32 %v242_v57, %v256_v58  ;;  %v254_v60 = vpop.permute.xlu0 %253 }
  0xc0   : > { %v273_v0 = vmax.f32 %v241_v61, %v254_v60 }
  0xc1   : > { %437 = vxpose.xlu1.b32.start.end [1/1] (short) (narrow) %v274_v59, 16 }
  0xc7   : > { %v260_v2 = vpop.permute.xlu0 %259 }
  0xc8   : > { %v276_v6 = vmax.f32 %v244_v3, %v260_v2 }
  0xc9   : > { %405 = vxpose.xlu0.b32.start.end [1/1] (short) (narrow) %v273_v0, 16 }
  0xca   : > { %373 = vxpose.xlu2.b32.start.end [1/1] (short) (narrow) %v272_v1, 16 }
  0xd9   : > { %501 = vxpose.xlu0.b32.start.end [1/1] (short) (narrow) %v276_v6, 16 }
  0xda   : > { %469 = vxpose.xlu2.b32.start.end [1/1] (short) (narrow) %v275_v7, 16 }
 0x148   : > { %v293_v8 = vpop.trf.xlu1 }
 0x149   : > { %534 = vst.msk [vmem:[#allocation2] sm:$0xff] %vm533_vm0, %v293_v8 }
 0x150   : > { %v294_v9 = vpop.trf.xlu1 }
 0x151   : > { %536 = vst.msk [vmem:[#allocation2 + $0x8] sm:$0x3f] %vm535_vm1, %v294_v9 }
 0x153   : > { %v325_v10 = vpop.trf.xlu2 }
 0x154   : > { %537 = vst.msk [vmem:[#allocation2 + $0x10] sm:$0xff] %vm533_vm0, %v325_v10 }
 0x158   : > { %v551_v11 = vld [vmem:[#allocation2] ss:$2 sm:$0x7f] }
 0x159   : > { %566 = vxpose.xlu1.b32.start.end [1/1] (short) (narrow) %v551_v11, 8 }
 0x15b   : > { %v326_v12 = vpop.trf.xlu2 }
 0x15c   : > { %538 = vst.msk [vmem:[#allocation2 + $0x18] sm:$0x3f] %vm535_vm1, %v326_v12 }
 0x15d   : > { %v357_v13 = vpop.trf.xlu0 }
 0x15e   : > { %539 = vst.msk [vmem:[#allocation2 + $0x20] sm:$0xff] %vm533_vm0, %v357_v13 }
 0x163   : > { %v389_v14 = vpop.trf.xlu2  ;;  %v553_v15 = vld [vmem:[#allocation2 + $0x10] ss:$2 sm:$0x7f] }
 0x164   : > { %541 = vst.msk [vmem:[#allocation2 + $0x30] sm:$0xff] %vm533_vm0, %v389_v14  ;;  %598 = vxpose.xlu2.b32.start.end [1/1] (short) (narrow) %v553_v15, 8 }
 0x165   : > { %v358_v16 = vpop.trf.xlu0  ;;  %v453_v17 = vpop.trf.xlu1 }
 0x166   : > { %540 = vst.msk [vmem:[#allocation2 + $0x28] sm:$0x3f] %vm535_vm1, %v358_v16 }
 0x167   : > { %545 = vst.msk [vmem:[#allocation2 + $0x50] sm:$0xff] %vm533_vm0, %v453_v17 }
 0x16b   : > { %v390_v18 = vpop.trf.xlu2 }
 0x16c   : > { %542 = vst.msk [vmem:[#allocation2 + $0x38] sm:$0x3f] %vm535_vm1, %v390_v18 }
 0x16d   : > { %v421_v19 = vpop.trf.xlu0  ;;  %v555_v20 = vld [vmem:[#allocation2 + $0x20] ss:$2 sm:$0x7f]  ;;  %v454_v21 = vpop.trf.xlu1 }
 0x16e   : > { %543 = vst.msk [vmem:[#allocation2 + $0x40] sm:$0xff] %vm533_vm0, %v421_v19  ;;  %630 = vxpose.xlu0.b32.start.end [1/1] (short) (narrow) %v555_v20, 8 }
 0x16f   : > { %546 = vst.msk [vmem:[#allocation2 + $0x58] sm:$0x3f] %vm535_vm1, %v454_v21 }
 0x173   : > { %v485_v22 = vpop.trf.xlu2  ;;  %v557_v23 = vld [vmem:[#allocation2 + $0x30] ss:$2 sm:$0x7f] }
 0x174   : > { %547 = vst.msk [vmem:[#allocation2 + $0x60] sm:$0xff] %vm533_vm0, %v485_v22  ;;  %662 = vxpose.xlu1.b32.start.end [1/1] (short) (narrow) %v557_v23, 8 }
 0x175   : > { %v422_v24 = vpop.trf.xlu0 }
 0x176   : > { %544 = vst.msk [vmem:[#allocation2 + $0x48] sm:$0x3f] %vm535_vm1, %v422_v24  ;;  %v561_v25 = vld [vmem:[#allocation2 + $0x50] ss:$2 sm:$0x7f] }
 0x177   : > { %726 = vxpose.xlu0.b32.start.end [1/1] (short) (narrow) %v561_v25, 8 }
 0x17b   : > { %v486_v26 = vpop.trf.xlu2 }
 0x17c   : > { %548 = vst.msk [vmem:[#allocation2 + $0x68] sm:$0x3f] %vm535_vm1, %v486_v26 }
 0x17d   : > { %v517_v27 = vpop.trf.xlu0  ;;  %v559_v28 = vld [vmem:[#allocation2 + $0x40] ss:$2 sm:$0x7f] }
 0x17e   : > { %549 = vst.msk [vmem:[#allocation2 + $0x70] sm:$0xff] %vm533_vm0, %v517_v27  ;;  %694 = vxpose.xlu2.b32.start.end [1/1] (short) (narrow) %v559_v28, 8 }
 0x183   : > { %v563_v29 = vld [vmem:[#allocation2 + $0x60] ss:$2 sm:$0x7f] }
 0x184   : > { %758 = vxpose.xlu1.b32.start.end [1/1] (short) (narrow) %v563_v29, 8 }
 0x185   : > { %v518_v30 = vpop.trf.xlu0 }
 0x186   : > { %550 = vst.msk [vmem:[#allocation2 + $0x78] sm:$0x3f] %vm535_vm1, %v518_v30 }
 0x18d   : > { %v565_v31 = vld [vmem:[#allocation2 + $0x70] ss:$2 sm:$0x7f] }
 0x18e   : > { %790 = vxpose.xlu2.b32.start.end [1/1] (short) (narrow) %v565_v31, 8 }
 0x1fd   : > { %v582_v32 = vpop.trf.xlu1  ;;  %v614_v33 = vpop.trf.xlu2 }
 0x1fe   : > { %823 = vst.msk [vmem:[%s140_s24] sm:$0x7f] %vm822_vm2, %v582_v32 }
 0x1ff   : > { %824 = vst.msk [vmem:[%s140_s24 + $0x8] sm:$0x7f] %vm822_vm2, %v614_v33 }
 0x212   : > { %v646_v34 = vpop.trf.xlu0 }
 0x213   : > { %825 = vst.msk [vmem:[%s140_s24 + $0x10] sm:$0x7f] %vm822_vm2, %v646_v34 }
 0x217   : > { %v710_v35 = vpop.trf.xlu2 }
 0x218   : > { %827 = vst.msk [vmem:[%s140_s24 + $0x20] sm:$0x7f] %vm822_vm2, %v710_v35  ;;  %v678_v36 = vpop.trf.xlu1 }
 0x219   : > { %826 = vst.msk [vmem:[%s140_s24 + $0x18] sm:$0x7f] %vm822_vm2, %v678_v36 }
 0x21b   : > { %v742_v37 = vpop.trf.xlu0 }
 0x21c   : > { %828 = vst.msk [vmem:[%s140_s24 + $0x28] sm:$0x7f] %vm822_vm2, %v742_v37 }
 0x227   : > { %v806_v38 = vpop.trf.xlu2 }
 0x228   : > { %830 = vst.msk [vmem:[%s140_s24 + $0x38] sm:$0x7f] %vm822_vm2, %v806_v38  ;;  %v774_v39 = vpop.trf.xlu1 }
 0x229   : > { %829 = vst.msk [vmem:[%s140_s24 + $0x30] sm:$0x7f] %vm822_vm2, %v774_v39 }
 0x22a PF: > { %p11_p7 = scmp.ge.s32.totalorder %s1081_s11, 4   ;;  %s1225_s6 = smov %s1037_s7 }
 0x22b   : > { %s1226_s7 = smov %s1041_s8  ;;  %s1227_s8 = smov %s1091_s14 }
 0x22c   : > { %s1228_s9 = smov %s1081_s11  ;;  %13 = sbr.rel (!%p11_p7) target bundleno = 3 (0x3), region = 94 }
 0x231   :  { %853 = vsyncpa [#allocation4], 1 }
 0x232   :  { %855 = vsyncpa [#allocation4 + $0x1], 1 }

</bundles_post_ra>
